<compile_context>
chip_gen: v7x
topology: tpu7x:2x2x1
jax: 0.10.0
libtpu: 0.0.40
codegen_flags: <defaults>
</compile_context>

<pallas_src>
import functools

import jax
import jax.numpy as jnp
from jax.experimental import pallas as pl
from jax.experimental.pallas import tpu as pltpu


def _round_up(v, m):
    return ((v + m - 1) // m) * m


def _vmem_capacity_bytes():
    """Physical per-core VMEM; conservative fallback if the query fails."""
    try:
        cap = getattr(pltpu.get_tpu_info(), "vmem_capacity_bytes", None)
        if cap:
            return int(cap)
    except Exception:
        pass
    return 64 * 1024 * 1024  # safe on v5e/v6e/v7x


def _choose_b_tile(B, per_b_bytes, block_budget_bytes, itemsize):
    """Pick the batch tile: big enough to amortize per-step overhead, small
    enough for >=2 grid steps (v7x megacore) and the per-generation budget,
    sublane-aligned and preferably a divisor of B."""
    pack = max(1, 32 // itemsize)          # 8 for f32, 16 for bf16
    bt = max(1, block_budget_bytes // max(per_b_bytes, 1))
    bt = min(bt, B)
    if B >= 2:
        bt = min(bt, (B + 1) // 2)         # guarantee grid length >= 2
    if bt >= pack:
        bt = (bt // pack) * pack           # keep pooled (bt, C) vreg-aligned
    # Prefer a divisor of B (balanced blocks, no masked tail block) as long
    # as it doesn't shrink the tile by more than ~2x.
    best_div = 1
    for d in range(bt, max(0, bt - 4096), -1):
        if B % d == 0:
            best_div = d
            break
    if best_div * 2 >= bt:
        bt = best_div
    return max(1, int(bt))


def _se_kernel(x_ref, w1_ref, w2_ref, o_ref, *, true_hw):
    # x_ref/o_ref: (b_tile, C, HW_pad); w1_ref: (C, Cr); w2_ref: (Cr, C)
    x = x_ref[...]                                    # native dtype, no f32 copy
    hw_pad = x.shape[-1]

    # Squeeze: avg + max pool over the spatial (lane) axis.  Sum accumulates
    # in f32; only the tiny pooled vectors are promoted.
    if hw_pad == true_hw:
        s = jnp.sum(x, axis=-1, dtype=jnp.float32)                 # (bt, C)
        mx = jnp.max(x, axis=-1).astype(jnp.float32)               # (bt, C)
    else:
        # Spatial axis was padded to a multiple of 128 lanes in the wrapper;
        # mask the pooling to the valid lanes (padding is zeros, harmless for
        # the gated writeback which is sliced off afterwards).
        lane = jax.lax.broadcasted_iota(jnp.int32, (1, 1, hw_pad), 2)
        valid = lane < true_hw
        zero = jnp.asarray(0, x.dtype)
        ninf = jnp.asarray(-jnp.inf, x.dtype)
        s = jnp.sum(jnp.where(valid, x, zero), axis=-1, dtype=jnp.float32)
        mx = jnp.max(jnp.where(valid, x, ninf), axis=-1).astype(jnp.float32)
    avg = s * jnp.float32(1.0 / true_hw)                           # (bt, C)

    # Excite: two tiny matmuls on the MXU, f32 accumulation.  Weights stay in
    # their stored dtype (bf16 weights take the native bf16 MXU path).
    w1 = w1_ref[...]
    w2 = w2_ref[...]
    wdt = w1.dtype
    h = (jnp.maximum(jnp.dot(avg.astype(wdt), w1,
                             preferred_element_type=jnp.float32), 0.0)
         + jnp.maximum(jnp.dot(mx.astype(wdt), w1,
                               preferred_element_type=jnp.float32), 0.0))
    logits = jnp.dot(h.astype(wdt), w2, preferred_element_type=jnp.float32)
    gate = jax.nn.sigmoid(logits)                                  # (bt, C)

    # Scale: broadcast the per-channel gate over the spatial axis; native
    # dtype multiply and a lane-dense full-width store.
    o_ref[...] = (x * gate[:, :, None].astype(x.dtype)).astype(o_ref.dtype)


def se_block(x_nchw, w1, w2, b_tile=None):
    """x_nchw: (B, C, H, W); w1: (C, C//r); w2: (C//r, C)."""
    B, C, H, W = x_nchw.shape
    HW = H * W
    Cr = w1.shape[1]
    itemsize = jnp.dtype(x_nchw.dtype).itemsize

    # Lane-dense stores: pad the spatial axis to a multiple of 128 lanes.
    HW_pad = _round_up(HW, 128) if HW % 128 else HW
    x_flat = x_nchw.reshape(B, C, HW)
    if HW_pad != HW:
        x_flat = jnp.pad(x_flat, ((0, 0), (0, 0), (0, HW_pad - HW)))

    # Generation-aware VMEM budgeting (v5e/v6e: 128 MiB -> ~16 MiB blocks,
    # 96 MiB limit; v7x: 64 MiB -> ~8 MiB blocks, 48 MiB limit).
    vmem_cap = _vmem_capacity_bytes()
    block_budget = vmem_cap // 8
    vmem_limit = int(vmem_cap * 3 // 4)

    per_b = C * HW_pad * itemsize
    if b_tile is None:
        b_tile = _choose_b_tile(B, per_b, block_budget, itemsize)
    b_tile = int(min(max(int(b_tile), 1), B))
    # TODO(synk): for very large C*HW where even a (1, C, HW_pad) block blows
    # the budget, add an HW-tiled ("arbitrary" axis) two-pass fallback with
    # VMEM sum/max accumulators instead of relying on vmem_limit headroom.

    grid = (pl.cdiv(B, b_tile),)

    # Advisory cost estimate: this kernel is HBM-bandwidth bound.
    cost = pl.CostEstimate(
        flops=int(3 * B * C * HW + 4 * B * C * Cr + 2 * B * Cr * C),
        transcendentals=int(B * C),  # sigmoid
        bytes_accessed=int(2 * B * C * HW_pad * itemsize
                           + (w1.size + w2.size) * jnp.dtype(w1.dtype).itemsize),
    )

    kernel = functools.partial(_se_kernel, true_hw=HW)

    out_flat = pl.pallas_call(
        kernel,
        out_shape=jax.ShapeDtypeStruct((B, C, HW_pad), x_nchw.dtype),
        grid=grid,
        in_specs=[
            pl.BlockSpec((b_tile, C, HW_pad), lambda i: (i, 0, 0)),
            pl.BlockSpec(w1.shape, lambda i: (0, 0)),   # resident across steps
            pl.BlockSpec(w2.shape, lambda i: (0, 0)),   # resident across steps
        ],
        out_specs=pl.BlockSpec((b_tile, C, HW_pad), lambda i: (i, 0, 0)),
        compiler_params=pltpu.CompilerParams(
            dimension_semantics=("parallel",),
            vmem_limit_bytes=vmem_limit,
        ),
        cost_estimate=cost,
    )(x_flat, w1, w2)

    if HW_pad != HW:
        out_flat = out_flat[..., :HW]
    return out_flat.reshape(B, C, H, W)


def se_block_ref(x_nchw, w1, w2):
    """Pure-JAX reference mirroring the PyTorch forward."""
    xf = x_nchw.astype(jnp.float32)
    w1f = w1.astype(jnp.float32)
    w2f = w2.astype(jnp.float32)
    avg = jnp.mean(xf, axis=(2, 3))            # (B, C)
    mx = jnp.max(xf, axis=(2, 3))              # (B, C)
    h = jax.nn.relu(avg @ w1f) + jax.nn.relu(mx @ w1f)
    gate = jax.nn.sigmoid(h @ w2f)             # (B, C)
    return (xf * gate[:, :, None, None]).astype(x_nchw.dtype)


if __name__ == "__main__":
    key = jax.random.PRNGKey(0)
    kx, k1, k2, kx2 = jax.random.split(key, 4)

    # ---- Case 1: B=2, C=4, 16x16, f32 (HW = 256, already lane-dense). ----
    B, C, H, W = 2, 4, 16, 16
    reduction = 4
    Cr = C // reduction

    x = jax.random.normal(kx, (B, C, H, W), dtype=jnp.float32)
    # nn.Linear(channel, channel//r, bias=False) has weight (C//r, C); we
    # store the transposed (in, out) layout so the kernel does y = x @ W.
    w1 = jax.random.normal(k1, (C, Cr), dtype=jnp.float32) * 0.5
    w2 = jax.random.normal(k2, (Cr, C), dtype=jnp.float32) * 0.5

    ref = se_block_ref(x, w1, w2)

    # Explicit b_tile=1 exercises the multi-step pipelined grid (grid=(2,)).
    out = jax.block_until_ready(se_block(x, w1, w2, b_tile=1))
    assert out.shape == (B, C, H, W)
    assert jnp.allclose(out, ref, atol=1e-5, rtol=1e-5), "mismatch (b_tile=1)"

    # Auto-tiled path (b_tile capped at ceil(B/2) -> still 2 grid steps).
    out2 = jax.block_until_ready(se_block(x, w1, w2))
    assert jnp.allclose(out2, ref, atol=1e-5, rtol=1e-5), "mismatch (auto)"

    # ---- Case 2: 7x7 spatial (HW = 49) exercises the padded/masked path. ----
    B2, C2, H2, W2 = 4, 8, 7, 7
    Cr2 = C2 // reduction
    xb = jax.random.normal(kx2, (B2, C2, H2, W2), dtype=jnp.float32)
    w1b = jax.random.normal(k1, (C2, Cr2), dtype=jnp.float32) * 0.5
    w2b = jax.random.normal(k2, (Cr2, C2), dtype=jnp.float32) * 0.5
    refb = se_block_ref(xb, w1b, w2b)
    outb = jax.block_until_ready(se_block(xb, w1b, w2b))
    assert jnp.allclose(outb, refb, atol=1e-5, rtol=1e-5), "mismatch (HW=49)"

    # ---- Case 3: bf16 activations/weights (native bf16 MXU path). ----
    xh = x.astype(jnp.bfloat16)
    w1h = w1.astype(jnp.bfloat16)
    w2h = w2.astype(jnp.bfloat16)
    refh = se_block_ref(xh, w1h, w2h)
    outh = jax.block_until_ready(se_block(xh, w1h, w2h))
    assert jnp.allclose(outh.astype(jnp.float32), refh.astype(jnp.float32),
                        atol=5e-2, rtol=5e-2), "mismatch (bf16)"

    print("KERNEL_OK")
</pallas_src>

<mosaic_0001>
module attributes {stable_mosaic.version = 11 : i64} {
  func.func @_se_kernel(%arg0: i32, %arg1: memref<1x4x256xf32, #tpu.memory_space<vmem>>, %arg2: memref<4x1xf32, #tpu.memory_space<vmem>>, %arg3: memref<1x4xf32, #tpu.memory_space<vmem>>, %arg4: memref<1x4x256xf32, #tpu.memory_space<vmem>>) attributes {dimension_semantics = [#tpu.dimension_semantics<parallel>], iteration_bounds = array<i64: 2>, scalar_prefetch = 0 : i64, scratch_operands = 0 : i64, tpu.core_type = #tpu.core_type<tc>, window_params = [{transform_indices = @transform_0, window_bounds = array<i64: 1, 4, 256>}, {pipeline_mode = #tpu.pipeline_mode<synchronous>, transform_indices = @transform_1, window_bounds = array<i64: 4, 1>}, {pipeline_mode = #tpu.pipeline_mode<synchronous>, transform_indices = @transform_2, window_bounds = array<i64: 1, 4>}, {transform_indices = @transform_3, window_bounds = array<i64: 1, 4, 256>}]} {
    %c0 = arith.constant 0 : index
    %c0_0 = arith.constant 0 : index
    %c0_1 = arith.constant 0 : index
    %0 = vector.load %arg1[%c0, %c0_0, %c0_1] : memref<1x4x256xf32, #tpu.memory_space<vmem>>, vector<1x4x256xf32>
    %cst = arith.constant dense<0.000000e+00> : vector<1x4xf32>
    %1 = vector.multi_reduction <add>, %0, %cst [2] : vector<1x4x256xf32> to vector<1x4xf32>
    %cst_2 = arith.constant dense<0xFF800000> : vector<1x4xf32>
    %2 = vector.multi_reduction <maximumf>, %0, %cst_2 [2] : vector<1x4x256xf32> to vector<1x4xf32>
    %cst_3 = arith.constant 3.906250e-03 : f32
    %3 = vector.broadcast %cst_3 : f32 to vector<1x4xf32>
    %4 = arith.mulf %1, %3 : vector<1x4xf32>
    %c0_4 = arith.constant 0 : index
    %c0_5 = arith.constant 0 : index
    %5 = vector.load %arg2[%c0_4, %c0_5] : memref<4x1xf32, #tpu.memory_space<vmem>>, vector<4x1xf32>
    %c0_6 = arith.constant 0 : index
    %c0_7 = arith.constant 0 : index
    %6 = vector.load %arg3[%c0_6, %c0_7] : memref<1x4xf32, #tpu.memory_space<vmem>>, vector<1x4xf32>
    %cst_8 = arith.constant dense<0.000000e+00> : vector<1x1xf32>
    %7 = tpu.matmul %4, %5, %cst_8 {dimension_numbers = #tpu.dot_dimension_numbers<[1], [0], [0], [1], [0, 0, 1, 1], [], []>} : vector<1x4xf32>, vector<4x1xf32>, vector<1x1xf32> -> vector<1x1xf32>
    %cst_9 = arith.constant 0.000000e+00 : f32
    %8 = vector.broadcast %cst_9 : f32 to vector<1x1xf32>
    %9 = arith.maximumf %7, %8 : vector<1x1xf32>
    %cst_10 = arith.constant dense<0.000000e+00> : vector<1x1xf32>
    %10 = tpu.matmul %2, %5, %cst_10 {dimension_numbers = #tpu.dot_dimension_numbers<[1], [0], [0], [1], [0, 0, 1, 1], [], []>} : vector<1x4xf32>, vector<4x1xf32>, vector<1x1xf32> -> vector<1x1xf32>
    %cst_11 = arith.constant 0.000000e+00 : f32
    %11 = vector.broadcast %cst_11 : f32 to vector<1x1xf32>
    %12 = arith.maximumf %10, %11 : vector<1x1xf32>
    %13 = arith.addf %9, %12 : vector<1x1xf32>
    %cst_12 = arith.constant dense<0.000000e+00> : vector<1x4xf32>
    %14 = tpu.matmul %13, %6, %cst_12 {dimension_numbers = #tpu.dot_dimension_numbers<[1], [0], [0], [1], [0, 0, 1, 1], [], []>} : vector<1x1xf32>, vector<1x4xf32>, vector<1x4xf32> -> vector<1x4xf32>
    %15 = arith.negf %14 : vector<1x4xf32>
    %16 = math.exp %15 : vector<1x4xf32>
    %cst_13 = arith.constant 1.000000e+00 : f32
    %17 = vector.broadcast %cst_13 : f32 to vector<1x4xf32>
    %18 = arith.addf %17, %16 : vector<1x4xf32>
    %19 = arith.divf %17, %18 : vector<1x4xf32>
    %20 = vector.shape_cast %19 : vector<1x4xf32> to vector<1x4x1xf32>
    %21 = vector.broadcast %20 : vector<1x4x1xf32> to vector<1x4x256xf32>
    %22 = arith.mulf %0, %21 : vector<1x4x256xf32>
    %c0_14 = arith.constant 0 : index
    %c0_15 = arith.constant 0 : index
    %c0_16 = arith.constant 0 : index
    %23 = vector.load %arg4[%c0_14, %c0_15, %c0_16] : memref<1x4x256xf32, #tpu.memory_space<vmem>>, vector<1x4x256xf32>
    tpu.vector_store %arg4[%c0_14, %c0_15, %c0_16], %22 {strides = array<i32>} : memref<1x4x256xf32, #tpu.memory_space<vmem>>, vector<1x4x256xf32>,
    return
  }
  func.func @transform_0(%arg0: i32) -> (i32, i32, i32) {
    %c0_i32 = arith.constant 0 : i32
    %c0_i32_0 = arith.constant 0 : i32
    %c0_i32_1 = arith.constant 0 : i32
    return %arg0, %c0_i32, %c0_i32_0 : i32, i32, i32
  }
  func.func @transform_1(%arg0: i32) -> (i32, i32) {
    %c0_i32 = arith.constant 0 : i32
    %c0_i32_0 = arith.constant 0 : i32
    %c0_i32_1 = arith.constant 0 : i32
    return %c0_i32, %c0_i32_0 : i32, i32
  }
  func.func @transform_2(%arg0: i32) -> (i32, i32) {
    %c0_i32 = arith.constant 0 : i32
    %c0_i32_0 = arith.constant 0 : i32
    %c0_i32_1 = arith.constant 0 : i32
    return %c0_i32, %c0_i32_0 : i32, i32
  }
  func.func @transform_3(%arg0: i32) -> (i32, i32, i32) {
    %c0_i32 = arith.constant 0 : i32
    %c0_i32_0 = arith.constant 0 : i32
    %c0_i32_1 = arith.constant 0 : i32
    return %arg0, %c0_i32, %c0_i32_0 : i32, i32, i32
  }
}

</mosaic_0001>

<bundles_post_ra>
// kernel: tpu_custom_call.1
= control target key start
LH: loop header
LB: loop body
LE: loop exit
PB: predicated region body
PF: predicated region fallthrough
CT: control target
= control target key end

     0   :  { %8 = vsyncpa [#allocation3], 0  ;;  %s963_s0 = inlined_call_operand.hbm [shape: f32[2,4,256], index: 0, kind: input, shape index: {}]   ;;  %s964_s1 = inlined_call_operand.vmem [shape: f32[4,1], index: 1, kind: input, shape index: {}]   ;;  %s965_s2 = inlined_call_operand.vmem [shape: f32[1,4], index: 2, kind: input, shape index: {}]   ;;  %s966_s3 = inlined_call_operand.hbm [shape: f32[2,4,256], index: 3, kind: output, shape index: {}]  }
   0x1   :  { %10 = vsyncpa [#allocation3 + $0x1], 0 }
   0x2   :  { %11 = vsyncpa [#allocation4], 0 }
   0x3   :  { %13 = vsyncpa [#allocation4 + $0x1], 0  ;;  %s776_s12 = smov 0   ;;  %s778_s13 = smov 0  }
   0x4   :  { %s780_s14 = smov 0   ;;  %s782_s15 = smov 0  }
   0x5 LB: > { %s797_s16 = sadd.s32 4294967295, %s749_s15   ;;  %s555_s17 = sadd.s32 4294967294, %s749_s15   ;;  %s749_s15 = sphi %s782_s15, %s981_s15   ;;  %s745_s14 = sphi %s780_s14, %s980_s14   ;;  %s741_s13 = sphi %s778_s13, %s979_s13   ;;  %s737_s12 = sphi %s776_s12, %s978_s12  }
   0x6   : > { %s801_s18 = sadd.s32 1, %s749_s15   ;;  %s26_s19 = sadd.s32 1, %s745_s14 }
   0x7   : > { %s23_s20 = ssub.s32 %s749_s15, %s801_s18  ;;  %p33_p0 = scmp.ne.s32.totalorder %s745_s14, %s741_s13 }
   0x8   : > { %p24_p1 = scmp.eq.s32.totalorder %s23_s20, 0  ;;  %p34_p2 = scmp.eq.s32.totalorder %s749_s15, 0 }
   0x9   : > { %p39_p3 = scmp.ne.s32.totalorder %s741_s13, %s737_s12  ;;  %p40_p4 = scmp.eq.s32.totalorder %s797_s16, 0 }
   0xa   : > { %s813_s21 = scalar_select %p24_p1, %s745_s14, %s26_s19  }
   0xb   : > { %p815_p5 = por %p34_p2, %p33_p0  ;;  %p819_p6 = por %p40_p4, %p39_p3 }
   0xc   : > { %p105_p7 = scmp.eq.s32.totalorder %s797_s16, 1  ;;  %p111_p8 = scmp.eq.s32.totalorder %s555_s17, 1 }
   0xd   : > { %p611_p10 = scmp.lt.s32.totalorder %s749_s15, 2  ;;  %s137_s26 = sand.u32 1, %s745_s14  }
   0xe   : > { %p826_p11 = por %p105_p7, %p33_p0  ;;  %p830_p12 = por %p111_p8, %p39_p3 }
   0xf   : > { %s576_s27 = sshll.u32 %s749_s15, 7  ;;  %s558_s28 = sshll.u32 %s137_s26, 3 }
  0x10   : > { %s970_s24 = scalar_select %p826_p11, 1, 0 }
  0x11   : > { %s971_s25 = scalar_select %p830_p12, 1, 0 }
  0x12   : > { %s839_s4 = scalar_lea.hbm %s963_s0, %s576_s27  ;;  %s141_s5 = scalar_lea.vmem [#allocation2], %s558_s28 }
  0x13   : > { %s149_s6 = sshll.u32 %s141_s5, 4  ;;  %p843_p13 = pnand %p611_p10, %p815_p5  ;;  %s847_s6 = int_to_ptr.vmem [resolvable:$true] %s149_s6 }
  0x14   : > { %s138_s8 = scalar_lea.sflag [#allocation3], %s137_s26  ;;  %s653_s9 = scalar_lea.hbm %s839_s4, 128 }
  0x15   : > { %p654_p2 = scmp.ne.s32.totalorder %s839_s4, %s653_s9  ;;  %p655_p3 = pneg %p843_p13 }
  0x16   : > { %s658_s17 = scalar_lea.hbm %s963_s0, 256  ;;  %p659_p5 = scmp.lt.u32.totalorder %s839_s4, %s963_s0 }
  0x17   : > { %p656_p4 = pnand %p655_p3, %p654_p2  ;;  %p660_p8 = scmp.lt.u32.totalorder %s658_s17, %s653_s9 }
  0x18   : > { %p662_p9 = scmp.lt.u32.totalorder %s653_s9, %s839_s4 }
  0x19   : > { %p657_p7 = pneg %p656_p4  ;;  %p661_p10 = por %p660_p8, %p659_p5 }
  0x1b   : > { %p663_p0 = por %p662_p9, %p661_p10 }
  0x1d   : > { %p664_p1 = pnand %p663_p0, %p657_p7 }
  0x1f   : > { %667 = shalt.err (!%p664_p1)
}
  0x20   : > { %s668_s22 = scalar_lea.vmem %s847_s6, 128  ;;  %s751_s26 = smov [#allocation2]  }
  0x21   : > { %p669_p2 = scmp.ne.s32.totalorder %s847_s6, %s668_s22  ;;  %s673_s27 = sshll.u32 %s751_s26, 4  ;;  %s674_s27 = int_to_ptr.vmem [resolvable:$false] %s673_s27 }
  0x22   : > { %s675_s28 = scalar_lea.vmem %s674_s27, 256  ;;  %p676_p11 = scmp.lt.s32.totalorder %s847_s6, %s674_s27 }
  0x23   : > { %p671_p4 = pnand %p669_p2, %p655_p3  ;;  %p677_p5 = scmp.lt.s32.totalorder %s675_s28, %s668_s22 }
  0x25   : > { %p672_p12 = pneg %p671_p4  ;;  %p678_p8 = por %p677_p5, %p676_p11 }
  0x27   : > { %p679_p9 = pnand %p678_p8, %p672_p12 }
  0x29   : > { %682 = shalt.err (!%p679_p9)
}
  0x2a   : > { %606 = dma.hbm_to_vmem [thread:$0]  (!%p843_p13), %s839_s4, 128, %s847_s6, %s138_s8  }
  0x2b   : > { %p973_p0 = scmp.lt.s32.totalorder %s749_s15, 3  ;;  %p974_p1 = scmp.ge.s32.totalorder %s749_s15, 1 }
  0x2d   : > { %p155_p3 = pnand %p974_p1, %p973_p0 }
  0x2e   : > { %s881_s29 = sand.u32 (!%p155_p3), 1, %s741_s13  }
  0x2f   : > { %158 = sbr.rel (%p155_p3) target bundleno = 798 (0x31e), region = 32  ;;  %s562_s30 = sshll.u32 (!%p155_p3), %s881_s29, 3 }
  0x30   : > { %s161_s5 = scalar_lea.sflag (!%p155_p3), [#allocation3], %s881_s29  ;;  %s164_s7 = scalar_lea.vmem (!%p155_p3), [#allocation2], %s562_s30 }
  0x36   : > { %728 = dma.done.wait (%p819_p6), %s161_s5, 128  }
  0x37   : > { %730 = vsyncadd (%p819_p6), %s161_s5, 4294967168  ;;  %vm191_vm0 = vcmask 1043456   ;;  %v891_v0 = vld [vmem:[%s164_s7] sm:$0xff]  ;;  %v752_v8 = vmov 0.0   ;;  %vm753_vm1 = vmmov 0   ;;  %v206_v10 = vlaneseq  ;;  %s577_s9 = sshll.u32 %s797_s16, 7 }
  0x38   : > { %v189_v1 = vcombine.high %v891_v0, %v891_v0  ;;  %v192_v2 = vsel %vm191_vm0, %v891_v0, 0.0  ;;  %v197_v4 = vsel %vm191_vm0, %v891_v0, -inf  ;;  %584 = vmatprep.subr.mxu0 %v752_v8  ;;  %v203_v9 = vld [vmem:[%s964_s1] sm:$0xf]  ;;  %589 = vmatprep.subr.mxu1 %v752_v8  ;;  %vm212_vm2 = vcmask 31744   ;;  %s186_s10 = scalar_lea.vmem [#allocation5], %s562_s30  ;;  %s919_s20 = scalar_lea.hbm %s966_s3, %s577_s9 }
  0x39   : > { %585 = vmatpush3.msk.msra.mxu0 %vm191_vm0, %v203_v9  ;;  %586 = vmatprep.mubr.msk.f32.mxu0 %vm753_vm1, %v752_v8  ;;  %v207_v11 = vand.u32 127, %v206_v10  ;;  %v209_v12 = vshrl.u32 %v206_v10, 7  ;;  %v204_v19 = vld [vmem:[%s965_s2] sm:$0x1]  ;;  %vm372_vm3 = vcmask 1040384   ;;  %vm368_vm4 = vcmask 7168  }
  0x3a   : > { %v193_v3 = vsel %vm191_vm0, %v189_v1, 0.0  ;;  %v198_v5 = vsel %vm191_vm0, %v189_v1, -inf  ;;  %590 = vmatpush3.msk.msra.mxu1 %vm191_vm0, %v203_v9  ;;  %591 = vmatprep.mubr.msk.f32.mxu1 %vm753_vm1, %v752_v8  ;;  %v754_v35 = vmov 839922192   ;;  %s485_s11 = sshll.u32 %s186_s10, 4  ;;  %s471_s22 = scalar_lea.sflag [#allocation4], %s881_s29  ;;  %s921_s11 = int_to_ptr.vmem [resolvable:$true] %s485_s11 }
  0x3b   : > { %v194_v6 = vadd.f32 %v193_v3, %v192_v2  ;;  %v199_v7 = vmax.f32 %v197_v4, %v198_v5  ;;  %594 = vmatprep.subr.mxu0 %v752_v8  ;;  %v210_v13 = vsub.s32 %v207_v11, %v209_v12  ;;  %v454_v32 = vsub.s32 0, %v209_v12  ;;  %s683_s26 = scalar_lea.vmem %s921_s11, 128  ;;  %p975_p11 = scmp.ne.s32.totalorder %s970_s24, 0 }
  0x3c   : > { %v461_v36 = vunpack.c.l.s4 %v754_v35  ;;  %p684_p6 = scmp.ne.s32.totalorder %s921_s11, %s683_s26  ;;  %s755_s16 = smov [#allocation5]  }
  0x3d   : > { %195 = vadd.xlane.f32.xlu0 %v194_v6  ;;  %s687_s27 = sshll.u32 %s755_s16, 4  ;;  %s688_s27 = int_to_ptr.vmem [resolvable:$false] %s687_s27 }
  0x3e   : > { %v462_v37 = vunpack.c.0.s8 %v461_v36  ;;  %p685_p12 = pnand %p684_p6, %p975_p11  ;;  %s689_s28 = scalar_lea.vmem %s688_s27, 256 }
  0x3f   : > { %p690_p7 = scmp.lt.s32.totalorder %s921_s11, %s688_s27  ;;  %p691_p10 = scmp.lt.s32.totalorder %s689_s28, %s683_s26 }
  0x40   : > { %v465_v38 = vsub.s32 %v462_v37, %v209_v12  ;;  %p686_p13 = pneg %p685_p12 }
  0x41   : > { %200 = vmax.xlane.f32.xlu0 %v199_v7  ;;  %p692_p2 = por %p691_p10, %p690_p7 }
  0x43   : > { %p693_p4 = pnand %p692_p2, %p686_p13 }
  0xca   : > { %v196_v14 = vpop.xlane.xlu0 %195 }
  0xcb   : > { %v202_v15 = vmul.f32 0.00390625, %v196_v14 }
  0xcd   : > { %v211_v16 = vrot.slane %v202_v15, %v210_v13 }
  0xce   : > { %v201_v17 = vpop.xlane.xlu0 %200 }
  0xcf   : > { %v293_v18 = vrot.slane %v201_v17, %v210_v13  ;;  %587 = vmatmul.mubr.msk.f32.vlgmr.msra.gmra.mrb[0].mxu0 %vm212_vm2, %v211_v16 }
  0xd0   : > { %596 = vmatprep.mubr.msk.f32.mxu0 %vm753_vm1, %v752_v8  ;;  %595 = vmatpush3.msk.msra.mxu0 %vm372_vm3, %v204_v19 }
  0xd1   : > { %592 = vmatmul.mubr.msk.f32.vlgmr.msra.gmra.mrb[0].mxu1 %vm212_vm2, %v293_v18 }
 0x1a2   : > { %v284_v20 = vpop.f32.mrb[0].mxu0 }
 0x1a3   : > { %v588_v21 = vpop.f32.mrb[1].mxu0  ;;  %v288_v23 = vmax.f32 %v284_v20, 0.0 }
 0x1a4   : > { %v362_v22 = vpop.f32.mrb[0].mxu1 }
 0x1a5   : > { %v366_v24 = vmax.f32 %v362_v22, 0.0  ;;  %v593_v25 = vpop.f32.mrb[1].mxu1 }
 0x1a7   : > { %v367_v26 = vadd.f32 %v366_v24, %v288_v23 }
 0x1a9   : > { %597 = vmatmul.mubr.msk.f32.vlgmr.msra.gmra.mrb[2].mxu0 %vm368_vm4, %v367_v26 }
 0x27c   : > { %v442_v27 = vpop.f32.mrb[2].mxu0 }
 0x27d   : > { %v570_v28 = vmul.f32 -1.442695, %v442_v27  ;;  %v598_v29 = vpop.f32.mrb[3].mxu0 }
 0x27f   : > { %649 = vpow2.f32 %v570_v28 }
 0x289   : > { %v650_v30 = vpop.eup %649 }
 0x28a   : > { %v449_v31 = vadd.f32 1.0, %v650_v30 }
 0x28c   : > { %651 = vrcp.f32 %v449_v31 }
 0x296   : > { %v652_v33 = vpop.eup %651 }
 0x297   : > { %v455_v34 = vrot.slane %v652_v33, %v454_v32 }
 0x299   : > { %457 = vbcast.lane.b32.xlu1 %v455_v34, 256 }
 0x30b   : > { %v458_v39 = vpop.permute.xlu1 %457 }
 0x30c   : > { %v466_v40 = vrot.slane %v458_v39, %v465_v38 }
 0x30e   : > { %v468_v41 = vmul.f32 %v466_v40, %v891_v0 }
 0x310   : > { %469 = vst [vmem:[%s186_s10] sm:$0xff] %v468_v41 }
 0x311   : > { %696 = shalt.err (!%p693_p4)
}
 0x312   : > { %s697_s29 = scalar_lea.hbm %s919_s20, 128  ;;  %s701_s7 = scalar_lea.hbm %s966_s3, 256 }
 0x313   : > { %p698_p5 = scmp.ne.s32.totalorder %s919_s20, %s697_s29  ;;  %p702_p0 = scmp.lt.u32.totalorder %s919_s20, %s966_s3 }
 0x314   : > { %p703_p1 = scmp.lt.u32.totalorder %s701_s7, %s697_s29  ;;  %p705_p6 = scmp.lt.u32.totalorder %s697_s29, %s919_s20 }
 0x315   : > { %p699_p8 = pnand %p698_p5, %p975_p11 }
 0x316   : > { %p704_p3 = por %p703_p1, %p702_p0 }
 0x317   : > { %p700_p9 = pneg %p699_p8 }
 0x318   : > { %p706_p12 = por %p705_p6, %p704_p3 }
 0x31a   : > { %p707_p13 = pnand %p706_p12, %p700_p9 }
 0x31c   : > { %710 = shalt.err (!%p707_p13)
}
 0x31d   : > { %601 = dma.vmem_to_hbm [thread:$0]  (%p975_p11), %s921_s11, 128, %s919_s20, %s471_s22  }
 0x31e PF: > { %s497_s6 = sand.u32 1, %s737_s12   ;;  %p976_p7 = scmp.ne.s32.totalorder %s971_s25, 0 }
 0x31f   : > { %p977_p10 = scmp.ge.s32.totalorder %s749_s15, 2  ;;  %s498_s8 = scalar_lea.sflag [#allocation4], %s497_s6 }
 0x321   : > { %p608_p2 = pnand %p977_p10, %p976_p7 }
 0x323   : > { %732 = dma.done.wait (!%p608_p2), %s498_s8, 128  }
 0x324   : > { %734 = vsyncadd (!%p608_p2), %s498_s8, 4294967168  ;;  %p16_p4 = scmp.ge.s32.totalorder %s801_s18, 4   ;;  %s978_s12 = smov %s741_s13 }
 0x325   : > { %s979_s13 = smov %s745_s14  ;;  %s980_s14 = smov %s813_s21 }
 0x326   : > { %s981_s15 = smov %s801_s18  ;;  %18 = sbr.rel (!%p16_p4) target bundleno = 5 (0x5), region = 77 }
 0x32d   :  { %503 = vsyncpa [#allocation3], 1 }
 0x32e   :  { %505 = vsyncpa [#allocation3 + $0x1], 1 }
 0x32f   :  { %506 = vsyncpa [#allocation4], 1 }
 0x330   :  { %508 = vsyncpa [#allocation4 + $0x1], 1 }

</bundles_post_ra>
